<compile_context>
chip_gen: v6e
topology: v6e:2x2x1
jax: 0.10.0
libtpu: 0.0.40
codegen_flags: <defaults>
</compile_context>

<pallas_src>
import jax
import jax.numpy as jnp
from jax.experimental import pallas as pl
from jax.experimental.pallas import tpu as pltpu


def _conv_gemm_bias_elu_kernel(p_ref, w_ref, b_ref, o_ref):
    # p_ref: (tm, K) patch tile; w_ref: (K, Cout); b_ref: (1, Cout); o_ref: (tm, Cout)
    acc = jnp.dot(p_ref[...], w_ref[...], preferred_element_type=jnp.float32)
    acc = acc + b_ref[...].astype(jnp.float32)
    # ELU(alpha=1): x if x > 0 else exp(x) - 1
    o_ref[...] = jnp.where(acc > 0.0, acc, jnp.exp(acc) - 1.0).astype(o_ref.dtype)


def conv2d_circular_elu(x, weight, bias, *, stride):
    """Pallas implementation of `_conv2d.forward`.

    x:      (B, Cin, H, W)   NCHW
    weight: (Cout, Cin, kH, kW) OIHW
    bias:   (Cout,)
    stride: int or (sH, sW)
    Returns (B, Cout, Ho, Wo) with Ho = (H - kH)//sH + 1, Wo = (W + 2 - kW)//sW + 1.
    """
    if isinstance(stride, int):
        sH, sW = stride, stride
    else:
        sH, sW = stride

    B, Cin, H, W = x.shape
    Cout, Cin_w, kH, kW = weight.shape
    assert Cin == Cin_w

    # Circular padding of width by 1 on each side (padding=(0, 1), mode='circular').
    x_pad = jnp.concatenate([x[..., -1:], x, x[..., :1]], axis=-1)  # (B, Cin, H, W+2)

    Ho = (H - kH) // sH + 1
    Wo = (W + 2 - kW) // sW + 1
    assert Ho > 0 and Wo > 0

    # im2col: (B, Ho, Wo, Cin * kH * kW), column ordering ci-major then (kh, kw)
    # to match weight.reshape(Cout, Cin*kH*kW).
    cols = []
    for kh in range(kH):
        for kw in range(kW):
            patch = x_pad[:, :, kh: kh + sH * (Ho - 1) + 1: sH,
                                kw: kw + sW * (Wo - 1) + 1: sW]  # (B, Cin, Ho, Wo)
            cols.append(patch)
    cols = jnp.stack(cols, axis=2)                      # (B, Cin, kH*kW, Ho, Wo)
    patches = jnp.transpose(cols, (0, 3, 4, 1, 2))      # (B, Ho, Wo, Cin, kH*kW)

    M = B * Ho * Wo
    K = Cin * kH * kW
    patches = patches.reshape(M, K)

    w_mat = weight.reshape(Cout, K).T                   # (K, Cout)
    b_mat = bias.reshape(1, Cout)

    # Large row tiles (~2 MiB per input buffer) so per-grid-step overhead is amortized.
    bytes_per_row = K * x.dtype.itemsize
    rows_budget = max(8, ((2 * 1024 * 1024) // max(bytes_per_row, 1)) // 8 * 8)
    tm = int(min(512, rows_budget))

    Mp = ((M + tm - 1) // tm) * tm
    if Mp != M:
        patches = jnp.pad(patches, ((0, Mp - M), (0, 0)))  # zero rows; sliced off below

    out_flat = pl.pallas_call(
        _conv_gemm_bias_elu_kernel,
        out_shape=jax.ShapeDtypeStruct((Mp, Cout), x.dtype),
        grid=(Mp // tm,),
        in_specs=[
            pl.BlockSpec((tm, K), lambda i: (i, 0)),
            pl.BlockSpec((K, Cout), lambda i: (0, 0)),
            pl.BlockSpec((1, Cout), lambda i: (0, 0)),
        ],
        out_specs=pl.BlockSpec((tm, Cout), lambda i: (i, 0)),
        compiler_params=pltpu.CompilerParams(
            dimension_semantics=("parallel",),
            vmem_limit_bytes=32 * 1024 * 1024,
        ),
    )(patches, w_mat, b_mat)

    out = out_flat[:M].reshape(B, Ho, Wo, Cout)
    return jnp.transpose(out, (0, 3, 1, 2))             # (B, Cout, Ho, Wo)


def _reference_conv2d_circular_elu(x, weight, bias, *, stride):
    if isinstance(stride, int):
        stride = (stride, stride)
    x_pad = jnp.concatenate([x[..., -1:], x, x[..., :1]], axis=-1)
    z = jax.lax.conv_general_dilated(
        x_pad, weight, window_strides=stride, padding="VALID",
        dimension_numbers=("NCHW", "OIHW", "NCHW"))
    z = z + bias[None, :, None, None]
    return jnp.where(z > 0.0, z, jnp.exp(z) - 1.0)


if __name__ == "__main__":
    key = jax.random.PRNGKey(0)
    k_x, k_w = jax.random.split(key)

    # Small shapes consistent with the module: batch=2, Cin=4, Cout=8, 16x16 spatial, 3x3 kernel.
    B, Cin, Cout, H, W, ksz = 2, 4, 8, 16, 16, 3
    x = jax.random.normal(k_x, (B, Cin, H, W), dtype=jnp.float32)
    # kaiming_normal_(mode='fan_out') ~ N(0, sqrt(2 / (Cout*kH*kW)))
    w = jax.random.normal(k_w, (Cout, Cin, ksz, ksz), dtype=jnp.float32) * jnp.sqrt(
        2.0 / (Cout * ksz * ksz))
    b = jnp.zeros((Cout,), dtype=jnp.float32)  # init.constant_(bias, 0)

    ok = True
    for stride in (1, 2):
        y = conv2d_circular_elu(x, w, b, stride=stride)
        y = jax.block_until_ready(y)
        ref = _reference_conv2d_circular_elu(x, w, b, stride=stride)
        assert y.shape == ref.shape, (y.shape, ref.shape)
        ok &= bool(jnp.allclose(y, ref, rtol=2e-2, atol=1e-2))

    assert ok, "Pallas conv2d+ELU does not match reference"
    print("KERNEL_OK")
</pallas_src>

<mosaic_0001>
module attributes {stable_mosaic.version = 11 : i64} {
  func.func @_conv_gemm_bias_elu_kernel(%arg0: i32, %arg1: memref<512x36xf32, #tpu.memory_space<vmem>>, %arg2: memref<36x8xf32, #tpu.memory_space<vmem>>, %arg3: memref<1x8xf32, #tpu.memory_space<vmem>>, %arg4: memref<512x8xf32, #tpu.memory_space<vmem>>) attributes {dimension_semantics = [#tpu.dimension_semantics<parallel>], iteration_bounds = array<i64: 1>, scalar_prefetch = 0 : i64, scratch_operands = 0 : i64, tpu.core_type = #tpu.core_type<tc>, window_params = [{transform_indices = @transform_0, window_bounds = array<i64: 512, 36>}, {pipeline_mode = #tpu.pipeline_mode<synchronous>, transform_indices = @transform_1, window_bounds = array<i64: 36, 8>}, {pipeline_mode = #tpu.pipeline_mode<synchronous>, transform_indices = @transform_2, window_bounds = array<i64: 1, 8>}, {transform_indices = @transform_3, window_bounds = array<i64: 512, 8>}]} {
    %c0 = arith.constant 0 : index
    %c0_0 = arith.constant 0 : index
    %0 = vector.load %arg1[%c0, %c0_0] : memref<512x36xf32, #tpu.memory_space<vmem>>, vector<512x36xf32>
    %c0_1 = arith.constant 0 : index
    %c0_2 = arith.constant 0 : index
    %1 = vector.load %arg2[%c0_1, %c0_2] : memref<36x8xf32, #tpu.memory_space<vmem>>, vector<36x8xf32>
    %cst = arith.constant dense<0.000000e+00> : vector<512x8xf32>
    %2 = tpu.matmul %0, %1, %cst {dimension_numbers = #tpu.dot_dimension_numbers<[1], [0], [0], [1], [0, 0, 1, 1], [], []>} : vector<512x36xf32>, vector<36x8xf32>, vector<512x8xf32> -> vector<512x8xf32>
    %c0_3 = arith.constant 0 : index
    %c0_4 = arith.constant 0 : index
    %3 = vector.load %arg3[%c0_3, %c0_4] : memref<1x8xf32, #tpu.memory_space<vmem>>, vector<1x8xf32>
    %4 = vector.broadcast %3 : vector<1x8xf32> to vector<512x8xf32>
    %5 = arith.addf %2, %4 : vector<512x8xf32>
    %cst_5 = arith.constant 0.000000e+00 : f32
    %6 = vector.broadcast %cst_5 : f32 to vector<512x8xf32>
    %7 = arith.cmpf ogt, %5, %6 : vector<512x8xf32>
    %8 = math.exp %5 : vector<512x8xf32>
    %cst_6 = arith.constant 1.000000e+00 : f32
    %9 = vector.broadcast %cst_6 : f32 to vector<512x8xf32>
    %10 = arith.subf %8, %9 : vector<512x8xf32>
    %11 = arith.select %7, %5, %10 : vector<512x8xi1>, vector<512x8xf32>
    %c0_7 = arith.constant 0 : index
    %c0_8 = arith.constant 0 : index
    %12 = vector.load %arg4[%c0_7, %c0_8] : memref<512x8xf32, #tpu.memory_space<vmem>>, vector<512x8xf32>
    tpu.vector_store %arg4[%c0_7, %c0_8], %11 {strides = array<i32>} : memref<512x8xf32, #tpu.memory_space<vmem>>, vector<512x8xf32>,
    return
  }
  func.func @transform_0(%arg0: i32) -> (i32, i32) {
    %c0_i32 = arith.constant 0 : i32
    %c0_i32_0 = arith.constant 0 : i32
    return %arg0, %c0_i32 : i32, i32
  }
  func.func @transform_1(%arg0: i32) -> (i32, i32) {
    %c0_i32 = arith.constant 0 : i32
    %c0_i32_0 = arith.constant 0 : i32
    %c0_i32_1 = arith.constant 0 : i32
    return %c0_i32, %c0_i32_0 : i32, i32
  }
  func.func @transform_2(%arg0: i32) -> (i32, i32) {
    %c0_i32 = arith.constant 0 : i32
    %c0_i32_0 = arith.constant 0 : i32
    %c0_i32_1 = arith.constant 0 : i32
    return %c0_i32, %c0_i32_0 : i32, i32
  }
  func.func @transform_3(%arg0: i32) -> (i32, i32) {
    %c0_i32 = arith.constant 0 : i32
    %c0_i32_0 = arith.constant 0 : i32
    return %arg0, %c0_i32 : i32, i32
  }
}

</mosaic_0001>

<bundles_post_ra>
// kernel: tpu_custom_call.1
= control target key start
LH: loop header
LB: loop body
LE: loop exit
PB: predicated region body
PF: predicated region fallthrough
CT: control target
= control target key end

     0   :  { %vm283_vm0 = vcmask 1043456   ;;  %vm90_vm1 = vcmask 293888   ;;  %vm992_vm2 = vcmask 64512   ;;  %s2557_s1 = inlined_call_operand.vmem [shape: f32[36,8], index: 1, kind: input, shape index: {}]   ;;  %s2558_s0 = inlined_call_operand.vmem [shape: f32[512,36], index: 0, kind: input, shape index: {}]   ;;  %s2559_s2 = inlined_call_operand.vmem [shape: f32[1,8], index: 2, kind: input, shape index: {}]   ;;  %s2560_s3 = inlined_call_operand.vmem [shape: f32[512,8], index: 3, kind: output, shape index: {}]  }
   0x1   :  { %v82_v0 = vld [vmem:[%s2557_s1 + $0x20] sm:$0xf]  ;;  %v81_v1 = vld [vmem:[%s2557_s1 + $0x18] sm:$0xff]  ;;  %v80_v2 = vld [vmem:[%s2557_s1 + $0x10] sm:$0xff] }
   0x2   :  { %1260 = vmatprep.subr.msk.mxu0 %vm283_vm0, %v82_v0  ;;  %1366 = vmatprep.subr.msk.mxu1 %vm283_vm0, %v82_v0  ;;  %v79_v3 = vld [vmem:[%s2557_s1 + $0x8] sm:$0xff]  ;;  %v78_v4 = vld [vmem:[%s2557_s1] sm:$0xff]  ;;  %v16_v9 = vld [vmem:[%s2558_s0 + $0x10] sm:$0xff] }
   0x3   :  { %1261 = vmatpush3.msk.msra.mxu0 %vm283_vm0, %v82_v0  ;;  %1371 = vmatpush3.msk.msra.mxu1 %vm283_vm0, %v82_v0  ;;  %v14_v5 = vld [vmem:[%s2558_s0] sm:$0xff]  ;;  %v15_v7 = vld [vmem:[%s2558_s0 + $0x8] sm:$0xff]  ;;  %v48_v10 = vld [vmem:[%s2558_s0 + $0x110] sm:$0xff] }
   0x4   :  { %1262 = vmatprep.subr.mxu0 %v81_v1  ;;  %1367 = vmatprep.subr.mxu1 %v81_v1  ;;  %v46_v6 = vld [vmem:[%s2558_s0 + $0x100] sm:$0xff]  ;;  %v47_v8 = vld [vmem:[%s2558_s0 + $0x108] sm:$0xff]  ;;  %v17_v11 = vld [vmem:[%s2558_s0 + $0x18] sm:$0xff] }
   0x5   :  { %1263 = vmatpush3.msra.mxu0 %v81_v1  ;;  %1372 = vmatpush3.msra.mxu1 %v81_v1  ;;  %v49_v12 = vld [vmem:[%s2558_s0 + $0x118] sm:$0xff]  ;;  %v18_v13 = vld [vmem:[%s2558_s0 + $0x20] sm:$0xff]  ;;  %v19_v15 = vld [vmem:[%s2558_s0 + $0x28] sm:$0xff] }
   0x6   :  { %1264 = vmatprep.subr.mxu0 %v80_v2  ;;  %1368 = vmatprep.subr.mxu1 %v80_v2  ;;  %v50_v14 = vld [vmem:[%s2558_s0 + $0x120] sm:$0xff]  ;;  %v51_v16 = vld [vmem:[%s2558_s0 + $0x128] sm:$0xff]  ;;  %v20_v17 = vld [vmem:[%s2558_s0 + $0x30] sm:$0xff] }
   0x7   :  { %1265 = vmatpush3.msra.mxu0 %v80_v2  ;;  %1373 = vmatpush3.msra.mxu1 %v80_v2  ;;  %v52_v18 = vld [vmem:[%s2558_s0 + $0x130] sm:$0xff]  ;;  %v21_v19 = vld [vmem:[%s2558_s0 + $0x38] sm:$0xff]  ;;  %v22_v21 = vld [vmem:[%s2558_s0 + $0x40] sm:$0xff] }
   0x8   :  { %1266 = vmatprep.subr.mxu0 %v79_v3  ;;  %1369 = vmatprep.subr.mxu1 %v79_v3  ;;  %v53_v20 = vld [vmem:[%s2558_s0 + $0x138] sm:$0xff]  ;;  %v54_v22 = vld [vmem:[%s2558_s0 + $0x140] sm:$0xff]  ;;  %v23_v23 = vld [vmem:[%s2558_s0 + $0x48] sm:$0xff] }
   0x9   :  { %1267 = vmatpush3.msra.mxu0 %v79_v3  ;;  %1374 = vmatpush3.msra.mxu1 %v79_v3  ;;  %v55_v24 = vld [vmem:[%s2558_s0 + $0x148] sm:$0xff]  ;;  %v24_v25 = vld [vmem:[%s2558_s0 + $0x50] sm:$0xff]  ;;  %v25_v27 = vld [vmem:[%s2558_s0 + $0x58] sm:$0xff] }
   0xa   :  { %1268 = vmatprep.subr.mxu0 %v78_v4  ;;  %1370 = vmatprep.subr.mxu1 %v78_v4  ;;  %v56_v26 = vld [vmem:[%s2558_s0 + $0x150] sm:$0xff]  ;;  %v57_v28 = vld [vmem:[%s2558_s0 + $0x158] sm:$0xff]  ;;  %v26_v29 = vld [vmem:[%s2558_s0 + $0x60] sm:$0xff] }
   0xb   :  { %1269 = vmatpush3.msra.mxu0 %v78_v4  ;;  %1375 = vmatpush3.msra.mxu1 %v78_v4  ;;  %v58_v30 = vld [vmem:[%s2558_s0 + $0x160] sm:$0xff]  ;;  %v27_v31 = vld [vmem:[%s2558_s0 + $0x68] sm:$0xff]  ;;  %v28_v33 = vld [vmem:[%s2558_s0 + $0x70] sm:$0xff] }
   0xc   :  { %1270 = vmatprep.mubr.msk.f32.mxu0 %vm90_vm1, %v14_v5  ;;  %1318 = vmatprep.mubr.msk.f32.mxu1 %vm90_vm1, %v46_v6  ;;  %v59_v32 = vld [vmem:[%s2558_s0 + $0x168] sm:$0xff]  ;;  %v60_v34 = vld [vmem:[%s2558_s0 + $0x170] sm:$0xff]  ;;  %v29_v35 = vld [vmem:[%s2558_s0 + $0x78] sm:$0xff] }
   0xd   :  { %1271 = vmatmul.mubr.msk.f32.vlgmr.msra.gmra.mxu0 %vm90_vm1, %v15_v7  ;;  %1319 = vmatmul.mubr.msk.f32.vlgmr.msra.gmra.mxu1 %vm90_vm1, %v47_v8  ;;  %v61_v36 = vld [vmem:[%s2558_s0 + $0x178] sm:$0xff]  ;;  %v30_v37 = vld [vmem:[%s2558_s0 + $0x80] sm:$0xff]  ;;  %v31_v39 = vld [vmem:[%s2558_s0 + $0x88] sm:$0xff] }
   0xe   :  { %1273 = vmatprep.mubr.msk.f32.mxu0 %vm90_vm1, %v16_v9  ;;  %1321 = vmatprep.mubr.msk.f32.mxu1 %vm90_vm1, %v48_v10  ;;  %v62_v38 = vld [vmem:[%s2558_s0 + $0x180] sm:$0xff]  ;;  %v63_v40 = vld [vmem:[%s2558_s0 + $0x188] sm:$0xff]  ;;  %v32_v41 = vld [vmem:[%s2558_s0 + $0x90] sm:$0xff] }
   0xf   :  { %v64_v42 = vld [vmem:[%s2558_s0 + $0x190] sm:$0xff]  ;;  %v33_v43 = vld [vmem:[%s2558_s0 + $0x98] sm:$0xff]  ;;  %v34_v45 = vld [vmem:[%s2558_s0 + $0xa0] sm:$0xff] }
  0x10   :  { %v65_v44 = vld [vmem:[%s2558_s0 + $0x198] sm:$0xff]  ;;  %v66_v46 = vld [vmem:[%s2558_s0 + $0x1a0] sm:$0xff]  ;;  %v35_v47 = vld [vmem:[%s2558_s0 + $0xa8] sm:$0xff] }
  0x11   :  { %1274 = vmatmul.mubr.msk.f32.gmra.mxu0 %vm90_vm1, %v17_v11  ;;  %1322 = vmatmul.mubr.msk.f32.gmra.mxu1 %vm90_vm1, %v49_v12  ;;  %v67_v48 = vld [vmem:[%s2558_s0 + $0x1a8] sm:$0xff]  ;;  %v36_v49 = vld [vmem:[%s2558_s0 + $0xb0] sm:$0xff]  ;;  %v37_v51 = vld [vmem:[%s2558_s0 + $0xb8] sm:$0xff] }
  0x12   :  { %1276 = vmatprep.mubr.msk.f32.mxu0 %vm90_vm1, %v18_v13  ;;  %1324 = vmatprep.mubr.msk.f32.mxu1 %vm90_vm1, %v50_v14  ;;  %v68_v50 = vld [vmem:[%s2558_s0 + $0x1b0] sm:$0xff]  ;;  %v69_v52 = vld [vmem:[%s2558_s0 + $0x1b8] sm:$0xff]  ;;  %v38_v53 = vld [vmem:[%s2558_s0 + $0xc0] sm:$0xff] }
  0x13   :  { %v70_v54 = vld [vmem:[%s2558_s0 + $0x1c0] sm:$0xff]  ;;  %v39_v55 = vld [vmem:[%s2558_s0 + $0xc8] sm:$0xff]  ;;  %v40_v57 = vld [vmem:[%s2558_s0 + $0xd0] sm:$0xff] }
  0x14   :  { %v71_v56 = vld [vmem:[%s2558_s0 + $0x1c8] sm:$0xff]  ;;  %v72_v58 = vld [vmem:[%s2558_s0 + $0x1d0] sm:$0xff]  ;;  %v41_v59 = vld [vmem:[%s2558_s0 + $0xd8] sm:$0xff] }
  0x15   :  { %1277 = vmatmul.mubr.msk.f32.gmra.mxu0 %vm90_vm1, %v19_v15  ;;  %1325 = vmatmul.mubr.msk.f32.gmra.mxu1 %vm90_vm1, %v51_v16  ;;  %v73_v60 = vld [vmem:[%s2558_s0 + $0x1d8] sm:$0xff]  ;;  %v42_v61 = vld [vmem:[%s2558_s0 + $0xe0] sm:$0xff]  ;;  %v43_v63 = vld [vmem:[%s2558_s0 + $0xe8] sm:$0xff] }
  0x16   :  { %1279 = vmatprep.mubr.msk.f32.mxu0 %vm90_vm1, %v20_v17  ;;  %1327 = vmatprep.mubr.msk.f32.mxu1 %vm90_vm1, %v52_v18  ;;  %v74_v62 = vld [vmem:[%s2558_s0 + $0x1e0] sm:$0xff]  ;;  %v75_v0 = vld [vmem:[%s2558_s0 + $0x1e8] sm:$0xff]  ;;  %v44_v1 = vld [vmem:[%s2558_s0 + $0xf0] sm:$0xff] }
  0x17   :  { %v76_v2 = vld [vmem:[%s2558_s0 + $0x1f0] sm:$0xff]  ;;  %v45_v3 = vld [vmem:[%s2558_s0 + $0xf8] sm:$0xff]  ;;  %v1798_v5 = vld [vmem:[%s2559_s2] ss:$0 sm:$0xff] }
  0x18   :  { %v77_v4 = vld [vmem:[%s2558_s0 + $0x1f8] sm:$0xff] }
  0x19   :  { %1280 = vmatmul.mubr.msk.f32.gmra.mxu0 %vm90_vm1, %v21_v19  ;;  %1328 = vmatmul.mubr.msk.f32.gmra.mxu1 %vm90_vm1, %v53_v20 }
  0x1a   :  { %1282 = vmatprep.mubr.msk.f32.mxu0 %vm90_vm1, %v22_v21  ;;  %1330 = vmatprep.mubr.msk.f32.mxu1 %vm90_vm1, %v54_v22 }
  0x1d   :  { %1283 = vmatmul.mubr.msk.f32.gmra.mxu0 %vm90_vm1, %v23_v23  ;;  %1331 = vmatmul.mubr.msk.f32.gmra.mxu1 %vm90_vm1, %v55_v24 }
  0x1e   :  { %1285 = vmatprep.mubr.msk.f32.mxu0 %vm90_vm1, %v24_v25  ;;  %1333 = vmatprep.mubr.msk.f32.mxu1 %vm90_vm1, %v56_v26 }
  0x21   :  { %1286 = vmatmul.mubr.msk.f32.gmra.mxu0 %vm90_vm1, %v25_v27  ;;  %1334 = vmatmul.mubr.msk.f32.gmra.mxu1 %vm90_vm1, %v57_v28 }
  0x22   :  { %1288 = vmatprep.mubr.msk.f32.mxu0 %vm90_vm1, %v26_v29  ;;  %1336 = vmatprep.mubr.msk.f32.mxu1 %vm90_vm1, %v58_v30 }
  0x25   :  { %1289 = vmatmul.mubr.msk.f32.gmra.mxu0 %vm90_vm1, %v27_v31  ;;  %1337 = vmatmul.mubr.msk.f32.gmra.mxu1 %vm90_vm1, %v59_v32 }
  0x26   :  { %1291 = vmatprep.mubr.msk.f32.mxu0 %vm90_vm1, %v28_v33  ;;  %1339 = vmatprep.mubr.msk.f32.mxu1 %vm90_vm1, %v60_v34 }
  0x29   :  { %1292 = vmatmul.mubr.msk.f32.gmra.mxu0 %vm90_vm1, %v29_v35  ;;  %1340 = vmatmul.mubr.msk.f32.gmra.mxu1 %vm90_vm1, %v61_v36 }
  0x2a   :  { %1294 = vmatprep.mubr.msk.f32.mxu0 %vm90_vm1, %v30_v37  ;;  %1342 = vmatprep.mubr.msk.f32.mxu1 %vm90_vm1, %v62_v38 }
  0x2d   :  { %1295 = vmatmul.mubr.msk.f32.gmra.mxu0 %vm90_vm1, %v31_v39  ;;  %1343 = vmatmul.mubr.msk.f32.gmra.mxu1 %vm90_vm1, %v63_v40 }
  0x2e   :  { %1297 = vmatprep.mubr.msk.f32.mxu0 %vm90_vm1, %v32_v41  ;;  %1345 = vmatprep.mubr.msk.f32.mxu1 %vm90_vm1, %v64_v42 }
  0x31   :  { %1298 = vmatmul.mubr.msk.f32.gmra.mxu0 %vm90_vm1, %v33_v43  ;;  %1346 = vmatmul.mubr.msk.f32.gmra.mxu1 %vm90_vm1, %v65_v44 }
  0x32   :  { %1300 = vmatprep.mubr.msk.f32.mxu0 %vm90_vm1, %v34_v45  ;;  %1348 = vmatprep.mubr.msk.f32.mxu1 %vm90_vm1, %v66_v46 }
  0x35   :  { %1301 = vmatmul.mubr.msk.f32.gmra.mxu0 %vm90_vm1, %v35_v47  ;;  %1349 = vmatmul.mubr.msk.f32.gmra.mxu1 %vm90_vm1, %v67_v48 }
  0x36   :  { %1303 = vmatprep.mubr.msk.f32.mxu0 %vm90_vm1, %v36_v49  ;;  %1351 = vmatprep.mubr.msk.f32.mxu1 %vm90_vm1, %v68_v50 }
  0x39   :  { %1304 = vmatmul.mubr.msk.f32.gmra.mxu0 %vm90_vm1, %v37_v51  ;;  %1352 = vmatmul.mubr.msk.f32.gmra.mxu1 %vm90_vm1, %v69_v52 }
  0x3a   :  { %1306 = vmatprep.mubr.msk.f32.mxu0 %vm90_vm1, %v38_v53  ;;  %1354 = vmatprep.mubr.msk.f32.mxu1 %vm90_vm1, %v70_v54 }
  0x3d   :  { %1307 = vmatmul.mubr.msk.f32.gmra.mxu0 %vm90_vm1, %v39_v55  ;;  %1355 = vmatmul.mubr.msk.f32.gmra.mxu1 %vm90_vm1, %v71_v56 }
  0x3e   :  { %1309 = vmatprep.mubr.msk.f32.mxu0 %vm90_vm1, %v40_v57  ;;  %1357 = vmatprep.mubr.msk.f32.mxu1 %vm90_vm1, %v72_v58 }
  0x41   :  { %1310 = vmatmul.mubr.msk.f32.gmra.mxu0 %vm90_vm1, %v41_v59  ;;  %1358 = vmatmul.mubr.msk.f32.gmra.mxu1 %vm90_vm1, %v73_v60 }
  0x42   :  { %1312 = vmatprep.mubr.msk.f32.mxu0 %vm90_vm1, %v42_v61  ;;  %1360 = vmatprep.mubr.msk.f32.mxu1 %vm90_vm1, %v74_v62 }
  0x45   :  { %1313 = vmatmul.mubr.msk.f32.gmra.mxu0 %vm90_vm1, %v43_v63  ;;  %1361 = vmatmul.mubr.msk.f32.gmra.mxu1 %vm90_vm1, %v75_v0 }
  0x46   :  { %1315 = vmatprep.mubr.msk.f32.mxu0 %vm90_vm1, %v44_v1  ;;  %1363 = vmatprep.mubr.msk.f32.mxu1 %vm90_vm1, %v76_v2 }
  0x49   :  { %1316 = vmatmul.mubr.msk.f32.gmra.mxu0 %vm90_vm1, %v45_v3  ;;  %1364 = vmatmul.mubr.msk.f32.gmra.mxu1 %vm90_vm1, %v77_v4 }
  0xcd   :  { %v1272_v6 = vpop.f32.mrf.mxu0  ;;  %v1320_v7 = vpop.f32.mrf.mxu1 }
  0xce   :  { %v1801_v8 = vadd.f32 %v1272_v6, %v1798_v5  ;;  %v1804_v9 = vadd.f32 %v1320_v7, %v1798_v5 }
  0xcf   :  { %v353_v10 = vpop.f32.mrf.mxu0  ;;  %v513_v11 = vpop.f32.mrf.mxu1 }
  0xd0   :  { %v738_v12 = vmul.f32 1.442695, %v1801_v8  ;;  %v802_v13 = vmul.f32 1.442695, %v1804_v9  ;;  %v1809_v14 = vadd.f32 %v1798_v5, %v353_v10  ;;  %v1812_v15 = vadd.f32 %v1798_v5, %v513_v11 }
  0xd1   :  { %v1275_v16 = vpop.f32.mrf.mxu0  ;;  %v1323_v17 = vpop.f32.mrf.mxu1  ;;  %vm673_vm3 = vcmp.gt.f32.partialorder %v1801_v8, 0.0  ;;  %vm705_vm4 = vcmp.gt.f32.partialorder %v1804_v9, 0.0 }
  0xd2   :  { %1376 = vpow2.f32 %v738_v12  ;;  %v1815_v18 = vadd.f32 %v1275_v16, %v1798_v5  ;;  %v1818_v19 = vadd.f32 %v1323_v17, %v1798_v5  ;;  %v736_v20 = vmul.f32 1.442695, %v1809_v14 }
  0xd3   :  { %1378 = vpow2.f32 %v802_v13  ;;  %v363_v21 = vpop.f32.mrf.mxu0  ;;  %v523_v22 = vpop.f32.mrf.mxu1  ;;  %v800_v23 = vmul.f32 1.442695, %v1812_v15  ;;  %vm672_vm5 = vcmp.gt.f32.partialorder %v1809_v14, 0.0  ;;  %vm704_vm6 = vcmp.gt.f32.partialorder %v1812_v15, 0.0 }
  0xd4   :  { %v742_v24 = vmul.f32 1.442695, %v1815_v18  ;;  %1380 = vpow2.f32 %v736_v20  ;;  %v806_v25 = vmul.f32 1.442695, %v1818_v19  ;;  %v1825_v26 = vadd.f32 %v1798_v5, %v363_v21 }
  0xd5   :  { %v1828_v27 = vadd.f32 %v1798_v5, %v523_v22  ;;  %v1278_v28 = vpop.f32.mrf.mxu0  ;;  %v1326_v29 = vpop.f32.mrf.mxu1  ;;  %1382 = vpow2.f32 %v800_v23  ;;  %vm675_vm7 = vcmp.gt.f32.partialorder %v1815_v18, 0.0  ;;  %vm707_vm8 = vcmp.gt.f32.partialorder %v1818_v19, 0.0 }
  0xd6   :  { %v1831_v30 = vadd.f32 %v1278_v28, %v1798_v5  ;;  %v1834_v31 = vadd.f32 %v1326_v29, %v1798_v5  ;;  %1384 = vpow2.f32 %v742_v24  ;;  %v740_v32 = vmul.f32 1.442695, %v1825_v26 }
  0xd7   :  { %v373_v33 = vpop.f32.mrf.mxu0  ;;  %v533_v34 = vpop.f32.mrf.mxu1  ;;  %1386 = vpow2.f32 %v806_v25  ;;  %v804_v35 = vmul.f32 1.442695, %v1828_v27  ;;  %vm674_vm9 = vcmp.gt.f32.partialorder %v1825_v26, 0.0  ;;  %vm706_vm10 = vcmp.gt.f32.partialorder %v1828_v27, 0.0 }
  0xd8   :  { %v746_v36 = vmul.f32 1.442695, %v1831_v30  ;;  %1388 = vpow2.f32 %v740_v32  ;;  %v810_v37 = vmul.f32 1.442695, %v1834_v31  ;;  %v1841_v38 = vadd.f32 %v1798_v5, %v373_v33 }
  0xd9   :  { %v1281_v39 = vpop.f32.mrf.mxu0  ;;  %v1329_v40 = vpop.f32.mrf.mxu1  ;;  %1390 = vpow2.f32 %v804_v35  ;;  %v1844_v41 = vadd.f32 %v1798_v5, %v533_v34  ;;  %vm677_vm11 = vcmp.gt.f32.partialorder %v1831_v30, 0.0  ;;  %vm709_vm12 = vcmp.gt.f32.partialorder %v1834_v31, 0.0 }
  0xda   :  { %v1847_v42 = vadd.f32 %v1281_v39, %v1798_v5  ;;  %v1850_v43 = vadd.f32 %v1329_v40, %v1798_v5  ;;  %1392 = vpow2.f32 %v746_v36  ;;  %v744_v44 = vmul.f32 1.442695, %v1841_v38 }
  0xdb   :  { %v383_v45 = vpop.f32.mrf.mxu0  ;;  %v543_v46 = vpop.f32.mrf.mxu1  ;;  %1394 = vpow2.f32 %v810_v37  ;;  %v808_v47 = vmul.f32 1.442695, %v1844_v41  ;;  %vm676_vm13 = vcmp.gt.f32.partialorder %v1841_v38, 0.0  ;;  %vm708_vm14 = vcmp.gt.f32.partialorder %v1844_v41, 0.0 }
  0xdc   :  { %1396 = vpow2.f32 %v744_v44  ;;  %v750_v48 = vmul.f32 1.442695, %v1847_v42  ;;  %v814_v49 = vmul.f32 1.442695, %v1850_v43  ;;  %v1860_v52 = vadd.f32 %v1798_v5, %v383_v45 }
  0xdd   :  { %v1284_v50 = vpop.f32.mrf.mxu0  ;;  %v1332_v51 = vpop.f32.mrf.mxu1  ;;  %1398 = vpow2.f32 %v808_v47  ;;  %v1863_v53 = vadd.f32 %v1798_v5, %v543_v46  ;;  %vm679_vm15 = vcmp.gt.f32.partialorder %v1847_v42, 0.0  ;;  %vm711_vm0 = vcmp.gt.f32.partialorder %v1850_v43, 0.0 }
  0xde   :  { %v1866_v54 = vadd.f32 %v1284_v50, %v1798_v5  ;;  %1400 = vpow2.f32 %v750_v48  ;;  %v1871_v56 = vadd.f32 %v1332_v51, %v1798_v5  ;;  %v748_v61 = vmul.f32 1.442695, %v1860_v52 }
  0xdf   :  { %v1377_v55 = vpop.eup %1376  ;;  %v393_v57 = vpop.f32.mrf.mxu0  ;;  %1402 = vpow2.f32 %v814_v49  ;;  %v812_v63 = vmul.f32 1.442695, %v1863_v53  ;;  %vm678_vm1 = vcmp.gt.f32.partialorder %v1860_v52, 0.0 }
  0xe0   :  { %v553_v58 = vpop.f32.mrf.mxu1  ;;  %v1379_v59 = vpop.eup %1378  ;;  %v1128_v60 = vadd.f32 -1.0, %v1377_v55  ;;  %1404 = vpow2.f32 %v748_v61  ;;  %v754_v4 = vmul.f32 1.442695, %v1866_v54  ;;  %v818_v11 = vmul.f32 1.442695, %v1871_v56 }
  0xe1   :  { %v1160_v62 = vadd.f32 -1.0, %v1379_v59  ;;  %v1287_v0 = vpop.f32.mrf.mxu0  ;;  %v1381_v2 = vpop.eup %1380  ;;  %1406 = vpow2.f32 %v812_v63  ;;  %v1896_v17 = vadd.f32 %v1798_v5, %v393_v57  ;;  %v1899_v20 = vadd.f32 %v1798_v5, %v553_v58 }
  0xe2   :  { %v1335_v1 = vpop.f32.mrf.mxu1  ;;  %v929_v3 = vsel %vm673_vm3, %v1801_v8, %v1128_v60  ;;  %v1383_v6 = vpop.eup %1382  ;;  %v1127_v10 = vadd.f32 -1.0, %v1381_v2  ;;  %1408 = vpow2.f32 %v754_v4  ;;  %v1905_v23 = vadd.f32 %v1287_v0, %v1798_v5 }
  0xe3   :  { %994 = vst.msk [vmem:[%s2560_s3 + $0x8] sm:$0xff] %vm992_vm2, %v929_v3  ;;  %v961_v7 = vsel %vm705_vm4, %v1804_v9, %v1160_v62  ;;  %v403_v8 = vpop.f32.mrf.mxu0  ;;  %v1385_v13 = vpop.eup %1384  ;;  %v1159_v16 = vadd.f32 -1.0, %v1383_v6  ;;  %1410 = vpow2.f32 %v818_v11  ;;  %v752_v32 = vmul.f32 1.442695, %v1896_v17 }
  0xe4   :  { %v563_v12 = vpop.f32.mrf.mxu1  ;;  %1026 = vst.msk [vmem:[%s2560_s3 + $0x108] sm:$0xff] %vm992_vm2, %v961_v7  ;;  %v1387_v9 = vpop.eup %1386  ;;  %v928_v21 = vsel %vm672_vm5, %v1809_v14, %v1127_v10  ;;  %v1130_v22 = vadd.f32 -1.0, %v1385_v13  ;;  %v758_v47 = vmul.f32 1.442695, %v1905_v23  ;;  %v1962_v55 = vadd.f32 %v1798_v5, %v403_v8 }
  0xe5   :  { %v1907_v24 = vpop.f32.mrf.mxu0  ;;  %v1389_v28 = vpop.eup %1388  ;;  %993 = vst.msk [vmem:[%s2560_s3] sm:$0xff] %vm992_vm2, %v928_v21  ;;  %v960_v29 = vsel %vm704_vm6, %v1812_v15, %v1159_v16  ;;  %v1162_v14 = vadd.f32 -1.0, %v1387_v9  ;;  %v816_v15 = vmul.f32 1.442695, %v1899_v20  ;;  %1412 = vpow2.f32 %v752_v32 }
  0xe6   :  { %v1909_v25 = vpop.f32.mrf.mxu1  ;;  %v1391_v33 = vpop.eup %1390  ;;  %1025 = vst.msk [vmem:[%s2560_s3 + $0x100] sm:$0xff] %vm992_vm2, %v960_v29  ;;  %v931_v34 = vsel %vm675_vm7, %v1815_v18, %v1130_v22  ;;  %v1129_v35 = vadd.f32 -1.0, %v1389_v28  ;;  %vm710_vm3 = vcmp.gt.f32.partialorder %v1863_v53, 0.0  ;;  %vm681_vm4 = vcmp.gt.f32.partialorder %v1866_v54, 0.0 }
  0xe7   :  { %v413_v36 = vpop.f32.mrf.mxu0  ;;  %v1393_v39 = vpop.eup %1392  ;;  %996 = vst.msk [vmem:[%s2560_s3 + $0x18] sm:$0xff] %vm992_vm2, %v931_v34  ;;  %v963_v40 = vsel %vm707_vm8, %v1818_v19, %v1162_v14  ;;  %v1161_v44 = vadd.f32 -1.0, %v1391_v33  ;;  %1414 = vpow2.f32 %v816_v15  ;;  %v2033_v21 = vadd.f32 %v1909_v25, %v1798_v5 }
  0xe8   :  { %v1929_v37 = vpop.f32.mrf.mxu1  ;;  %v1395_v18 = vpop.eup %1394  ;;  %1028 = vst.msk [vmem:[%s2560_s3 + $0x118] sm:$0xff] %vm992_vm2, %v963_v40  ;;  %v930_v45 = vsel %vm674_vm9, %v1825_v26, %v1129_v35  ;;  %v1132_v46 = vadd.f32 -1.0, %v1393_v39  ;;  %v1959_v26 = vadd.f32 %v1335_v1, %v1798_v5  ;;  %1416 = vpow2.f32 %v758_v47 }
  0xe9   :  { %v1947_v48 = vpop.f32.mrf.mxu0  ;;  %v1397_v49 = vpop.eup %1396  ;;  %995 = vst.msk [vmem:[%s2560_s3 + $0x10] sm:$0xff] %vm992_vm2, %v930_v45  ;;  %v962_v50 = vsel %vm706_vm10, %v1828_v27, %v1161_v44  ;;  %v1164_v51 = vadd.f32 -1.0, %v1395_v18  ;;  %v1972_v27 = vadd.f32 %v1798_v5, %v563_v12  ;;  %v2036_v22 = vadd.f32 %v1798_v5, %v413_v36 }
  0xea   :  { %v1949_v19 = vpop.f32.mrf.mxu1  ;;  %v1399_v57 = vpop.eup %1398  ;;  %1027 = vst.msk [vmem:[%s2560_s3 + $0x110] sm:$0xff] %vm992_vm2, %v962_v50  ;;  %v933_v58 = vsel %vm677_vm11, %v1831_v30, %v1132_v46  ;;  %v1131_v59 = vadd.f32 -1.0, %v1397_v49  ;;  %v822_v0 = vmul.f32 1.442695, %v1959_v26  ;;  %v826_v34 = vmul.f32 1.442695, %v2033_v21 }
  0xeb   :  { %v1974_v60 = vpop.f32.mrf.mxu0  ;;  %v1401_v62 = vpop.eup %1400  ;;  %998 = vst.msk [vmem:[%s2560_s3 + $0x28] sm:$0xff] %vm992_vm2, %v933_v58  ;;  %v965_v63 = vsel %vm709_vm12, %v1834_v31, %v1164_v51  ;;  %v1163_v30 = vadd.f32 -1.0, %v1399_v57  ;;  %v756_v31 = vmul.f32 1.442695, %v1962_v55  ;;  %v820_v8 = vmul.f32 1.442695, %v1972_v27 }
  0xec   :  { %v1976_v61 = vpop.f32.mrf.mxu1  ;;  %v1403_v1 = vpop.eup %1402  ;;  %1030 = vst.msk [vmem:[%s2560_s3 + $0x128] sm:$0xff] %vm992_vm2, %v965_v63  ;;  %v932_v2 = vsel %vm676_vm13, %v1841_v38, %v1131_v59  ;;  %v1134_v3 = vadd.f32 -1.0, %v1401_v62  ;;  %1418 = vpow2.f32 %v822_v0  ;;  %vm713_vm5 = vcmp.gt.f32.partialorder %v1871_v56, 0.0 }
  0xed   :  { %v1996_v4 = vpop.f32.mrf.mxu0  ;;  %997 = vst.msk [vmem:[%s2560_s3 + $0x20] sm:$0xff] %vm992_vm2, %v932_v2  ;;  %v964_v7 = vsel %vm708_vm14, %v1844_v41, %v1163_v30  ;;  %v1166_v10 = vadd.f32 -1.0, %v1403_v1  ;;  %v1405_v38 = vpop.eup %1404  ;;  %1420 = vpow2.f32 %v756_v31  ;;  %v2018_v41 = vadd.f32 %v1907_v24, %v1798_v5 }
  0xee   :  { %v1998_v6 = vpop.f32.mrf.mxu1  ;;  %1029 = vst.msk [vmem:[%s2560_s3 + $0x120] sm:$0xff] %vm992_vm2, %v964_v7  ;;  %v935_v11 = vsel %vm679_vm15, %v1847_v42, %v1134_v3  ;;  %v1407_v16 = vpop.eup %1406  ;;  %v1133_v9 = vadd.f32 -1.0, %v1405_v38  ;;  %1422 = vpow2.f32 %v820_v8  ;;  %v760_v39 = vmul.f32 1.442695, %v2036_v22 }
  0xef   :  { %v2020_v12 = vpop.f32.mrf.mxu0  ;;  %1000 = vst.msk [vmem:[%s2560_s3 + $0x38] sm:$0xff] %vm992_vm2, %v935_v11  ;;  %v967_v42 = vsel %vm711_vm0, %v1850_v43, %v1166_v10  ;;  %v1409_v24 = vpop.eup %1408  ;;  %v1165_v28 = vadd.f32 -1.0, %v1407_v16  ;;  %v762_v43 = vmul.f32 1.442695, %v2018_v41  ;;  %v2069_v40 = vadd.f32 %v1798_v5, %v1929_v37 }
  0xf0   :  { %v2022_v13 = vpop.f32.mrf.mxu1  ;;  %1032 = vst.msk [vmem:[%s2560_s3 + $0x138] sm:$0xff] %vm992_vm2, %v967_v42  ;;  %v1411_v25 = vpop.eup %1410  ;;  %v934_v32 = vsel %vm678_vm1, %v1860_v52, %v1133_v9  ;;  %v1136_v33 = vadd.f32 -1.0, %v1409_v24  ;;  %v2084_v45 = vadd.f32 %v1949_v19, %v1798_v5  ;;  %v2088_v37 = vadd.f32 %v1798_v5, %v1974_v60 }
  0xf1   :  { %v2044_v29 = vpop.f32.mrf.mxu0  ;;  %999 = vst.msk [vmem:[%s2560_s3 + $0x30] sm:$0xff] %vm992_vm2, %v934_v32  ;;  %v966_v35 = vsel %vm710_vm3, %v1863_v53, %v1165_v28  ;;  %v1168_v15 = vadd.f32 -1.0, %v1411_v25  ;;  %1424 = vpow2.f32 %v762_v43  ;;  %vm680_vm6 = vcmp.gt.f32.partialorder %v1896_v17, 0.0 }
  0xf2   :  { %v2046_v14 = vpop.f32.mrf.mxu1  ;;  %1031 = vst.msk [vmem:[%s2560_s3 + $0x130] sm:$0xff] %vm992_vm2, %v966_v35  ;;  %v937_v52 = vsel %vm681_vm4, %v1866_v54, %v1136_v33  ;;  %1426 = vpow2.f32 %v826_v34  ;;  %v1413_v44 = vpop.eup %1412  ;;  %v2080_v54 = vadd.f32 %v1947_v48, %v1798_v5  ;;  %vm712_vm7 = vcmp.gt.f32.partialorder %v1899_v20, 0.0 }
  0xf3   :  { %v2059_v36 = vpop.f32.mrf.mxu0  ;;  %1002 = vst.msk [vmem:[%s2560_s3 + $0x48] sm:$0xff] %vm992_vm2, %v937_v52  ;;  %v969_v18 = vsel %vm713_vm5, %v1871_v56, %v1168_v15  ;;  %v1135_v47 = vadd.f32 -1.0, %v1413_v44  ;;  %1428 = vpow2.f32 %v760_v39  ;;  %v824_v56 = vmul.f32 1.442695, %v2069_v40 }
  0xf4   :  { %v2071_v53 = vpop.f32.mrf.mxu1  ;;  %v1415_v46 = vpop.eup %1414  ;;  %1034 = vst.msk [vmem:[%s2560_s3 + $0x148] sm:$0xff] %vm992_vm2, %v969_v18  ;;  %v766_v19 = vmul.f32 1.442695, %v2080_v54  ;;  %vm683_vm8 = vcmp.gt.f32.partialorder %v1905_v23, 0.0  ;;  %v830_v57 = vmul.f32 1.442695, %v2084_v45  ;;  %v2121_v63 = vadd.f32 %v1996_v4, %v1798_v5 }
  0xf5   :  { %v1167_v48 = vadd.f32 -1.0, %v1415_v46  ;;  %v2098_v49 = vpop.f32.mrf.mxu0  ;;  %v1417_v50 = vpop.eup %1416  ;;  %v936_v51 = vsel %vm680_vm6, %v1896_v17, %v1135_v47  ;;  %1430 = vpow2.f32 %v824_v56  ;;  %v764_v62 = vmul.f32 1.442695, %v2088_v37 }
  0xf6   :  { %v2103_v58 = vpop.f32.mrf.mxu1  ;;  %1001 = vst.msk [vmem:[%s2560_s3 + $0x40] sm:$0xff] %vm992_vm2, %v936_v51  ;;  %v1138_v60 = vadd.f32 -1.0, %v1417_v50  ;;  %1432 = vpow2.f32 %v766_v19  ;;  %v2117_v17 = vadd.f32 %v1798_v5, %v1976_v61  ;;  %v2130_v1 = vadd.f32 %v1798_v5, %v2020_v12 }
  0xf7   :  { %v968_v59 = vsel %vm712_vm7, %v1899_v20, %v1167_v48  ;;  %1434 = vpow2.f32 %v830_v57  ;;  %v2125_v20 = vadd.f32 %v1998_v6, %v1798_v5  ;;  %v453_v2 = vpop.f32.mrf.mxu0  ;;  %vm715_vm9 = vcmp.gt.f32.partialorder %v1959_v26, 0.0 }
  0xf8   :  { %1033 = vst.msk [vmem:[%s2560_s3 + $0x140] sm:$0xff] %vm992_vm2, %v968_v59  ;;  %v939_v0 = vsel %vm683_vm8, %v1905_v23, %v1138_v60  ;;  %1436 = vpow2.f32 %v764_v62  ;;  %v828_v31 = vmul.f32 1.442695, %v2117_v17  ;;  %v2140_v23 = vadd.f32 %v1798_v5, %v2022_v13  ;;  %v2142_v4 = vpop.f32.mrf.mxu1 }
  0xf9   :  { %v1419_v30 = vpop.eup %1418  ;;  %1004 = vst.msk [vmem:[%s2560_s3 + $0x58] sm:$0xff] %vm992_vm2, %v939_v0  ;;  %vm682_vm10 = vcmp.gt.f32.partialorder %v1962_v55, 0.0  ;;  %v770_v7 = vmul.f32 1.442695, %v2121_v63  ;;  %v834_v10 = vmul.f32 1.442695, %v2125_v20  ;;  %v2156_v16 = vpop.f32.mrf.mxu0  ;;  %v2165_v9 = vadd.f32 %v2044_v29, %v1798_v5 }
  0xfa   :  { %v1421_v3 = vpop.eup %1420  ;;  %v1170_v61 = vadd.f32 -1.0, %v1419_v30  ;;  %vm714_vm11 = vcmp.gt.f32.partialorder %v1972_v27, 0.0  ;;  %1438 = vpow2.f32 %v828_v31  ;;  %v768_v8 = vmul.f32 1.442695, %v2130_v1  ;;  %v2171_v24 = vpop.f32.mrf.mxu1 }
  0xfb   :  { %v1137_v6 = vadd.f32 -1.0, %v1421_v3  ;;  %v1423_v38 = vpop.eup %1422  ;;  %vm685_vm12 = vcmp.gt.f32.partialorder %v2018_v41, 0.0  ;;  %1440 = vpow2.f32 %v770_v7  ;;  %v2178_v32 = vadd.f32 %v1798_v5, %v2059_v36  ;;  %v463_v35 = vpop.f32.mrf.mxu0 }
  0xfc   :  { %v971_v11 = vsel %vm715_vm9, %v1959_v26, %v1170_v61  ;;  %v1169_v13 = vadd.f32 -1.0, %v1423_v38  ;;  %1442 = vpow2.f32 %v834_v10  ;;  %v832_v26 = vmul.f32 1.442695, %v2140_v23  ;;  %v2198_v39 = vpop.f32.mrf.mxu1 }
  0xfd   :  { %1036 = vst.msk [vmem:[%s2560_s3 + $0x158] sm:$0xff] %vm992_vm2, %v971_v11  ;;  %v938_v12 = vsel %vm682_vm10, %v1962_v55, %v1137_v6  ;;  %v2169_v55 = vadd.f32 %v2046_v14, %v1798_v5  ;;  %1444 = vpow2.f32 %v768_v8  ;;  %vm717_vm13 = vcmp.gt.f32.partialorder %v2033_v21, 0.0  ;;  %v2229_v50 = vpop.f32.mrf.mxu0 }
  0xfe   :  { %v1425_v42 = vpop.eup %1424  ;;  %1003 = vst.msk [vmem:[%s2560_s3 + $0x50] sm:$0xff] %vm992_vm2, %v938_v12  ;;  %v970_v43 = vsel %vm714_vm11, %v1972_v27, %v1169_v13  ;;  %1446 = vpow2.f32 %v832_v26  ;;  %v774_v14 = vmul.f32 1.442695, %v2165_v9  ;;  %vm684_vm14 = vcmp.gt.f32.partialorder %v2036_v22, 0.0  ;;  %v1356_v59 = vpop.f32.mrf.mxu1 }
  0xff   :  { %v1427_v28 = vpop.eup %1426  ;;  %v1140_v25 = vadd.f32 -1.0, %v1425_v42  ;;  %1035 = vst.msk [vmem:[%s2560_s3 + $0x150] sm:$0xff] %vm992_vm2, %v970_v43  ;;  %vm716_vm15 = vcmp.gt.f32.partialorder %v2069_v40, 0.0  ;;  %v838_v34 = vmul.f32 1.442695, %v2169_v55  ;;  %v2206_v44 = vadd.f32 %v1798_v5, %v2071_v53  ;;  %v2262_v61 = vpop.f32.mrf.mxu0 }
 0x100   :  { %v1172_v29 = vadd.f32 -1.0, %v1427_v28  ;;  %v1429_v33 = vpop.eup %1428  ;;  %1448 = vpow2.f32 %v774_v14  ;;  %v772_v52 = vmul.f32 1.442695, %v2178_v32  ;;  %v2214_v18 = vadd.f32 %v2103_v58, %v1798_v5 }
 0x101   :  { %v941_v27 = vsel %vm685_vm12, %v2018_v41, %v1140_v25  ;;  %v1139_v36 = vadd.f32 -1.0, %v1429_v33  ;;  %1450 = vpow2.f32 %v838_v34  ;;  %v2220_v48 = vadd.f32 %v1798_v5, %v453_v2 }
 0x102   :  { %1006 = vst.msk [vmem:[%s2560_s3 + $0x68] sm:$0xff] %vm992_vm2, %v941_v27  ;;  %v973_v15 = vsel %vm717_vm13, %v2033_v21, %v1172_v29  ;;  %v1431_v41 = vpop.eup %1430  ;;  %v2210_v21 = vadd.f32 %v2098_v49, %v1798_v5  ;;  %1452 = vpow2.f32 %v772_v52  ;;  %vm687_vm0 = vcmp.gt.f32.partialorder %v2080_v54, 0.0 }
 0x103   :  { %1038 = vst.msk [vmem:[%s2560_s3 + $0x168] sm:$0xff] %vm992_vm2, %v973_v15  ;;  %v1433_v46 = vpop.eup %1432  ;;  %v940_v47 = vsel %vm684_vm14, %v2036_v22, %v1139_v36  ;;  %v1171_v56 = vadd.f32 -1.0, %v1431_v41  ;;  %vm719_vm1 = vcmp.gt.f32.partialorder %v2084_v45, 0.0  ;;  %v836_v49 = vmul.f32 1.442695, %v2206_v44 }
 0x104   :  { %v1435_v53 = vpop.eup %1434  ;;  %1005 = vst.msk [vmem:[%s2560_s3 + $0x60] sm:$0xff] %vm992_vm2, %v940_v47  ;;  %v1142_v19 = vadd.f32 -1.0, %v1433_v46  ;;  %vm686_vm3 = vcmp.gt.f32.partialorder %v2088_v37, 0.0  ;;  %v778_v58 = vmul.f32 1.442695, %v2210_v21  ;;  %vm718_vm4 = vcmp.gt.f32.partialorder %v2117_v17, 0.0 }
 0x105   :  { %v1437_v22 = vpop.eup %1436  ;;  %v972_v51 = vsel %vm716_vm15, %v2069_v40, %v1171_v56  ;;  %v1174_v57 = vadd.f32 -1.0, %v1435_v53  ;;  %1454 = vpow2.f32 %v836_v49  ;;  %v842_v30 = vmul.f32 1.442695, %v2214_v18 }
 0x106   :  { %1037 = vst.msk [vmem:[%s2560_s3 + $0x160] sm:$0xff] %vm992_vm2, %v972_v51  ;;  %v943_v60 = vsel %vm687_vm0, %v2080_v54, %v1142_v19  ;;  %v1141_v62 = vadd.f32 -1.0, %v1437_v22  ;;  %1456 = vpow2.f32 %v778_v58  ;;  %v776_v0 = vmul.f32 1.442695, %v2220_v48 }
 0x107   :  { %1008 = vst.msk [vmem:[%s2560_s3 + $0x78] sm:$0xff] %vm992_vm2, %v943_v60  ;;  %v975_v40 = vsel %vm719_vm1, %v2084_v45, %v1174_v57  ;;  %v1439_v2 = vpop.eup %1438  ;;  %1458 = vpow2.f32 %v842_v30  ;;  %v2256_v3 = vadd.f32 %v1798_v5, %v2142_v4  ;;  %v2260_v45 = vadd.f32 %v2156_v16, %v1798_v5  ;;  %v633_v4 = vpop.f32.mrf.mxu1 }
 0x108   :  { %1040 = vst.msk [vmem:[%s2560_s3 + $0x178] sm:$0xff] %vm992_vm2, %v975_v40  ;;  %v942_v54 = vsel %vm686_vm3, %v2088_v37, %v1141_v62  ;;  %v1441_v31 = vpop.eup %1440  ;;  %v1173_v6 = vadd.f32 -1.0, %v1439_v2  ;;  %vm689_vm5 = vcmp.gt.f32.partialorder %v2121_v63, 0.0  ;;  %1460 = vpow2.f32 %v776_v0 }
 0x109   :  { %1007 = vst.msk [vmem:[%s2560_s3 + $0x70] sm:$0xff] %vm992_vm2, %v942_v54  ;;  %v2271_v37 = vadd.f32 %v2171_v24, %v1798_v5  ;;  %v1443_v7 = vpop.eup %1442  ;;  %v1144_v10 = vadd.f32 -1.0, %v1441_v31  ;;  %vm721_vm6 = vcmp.gt.f32.partialorder %v2125_v20, 0.0  ;;  %v840_v38 = vmul.f32 1.442695, %v2256_v3  ;;  %v1359_v29 = vpop.f32.mrf.mxu1 }
 0x10a   :  { %v2276_v11 = vadd.f32 %v1798_v5, %v463_v35  ;;  %v1445_v8 = vpop.eup %1444  ;;  %v974_v12 = vsel %vm718_vm4, %v2117_v17, %v1173_v6  ;;  %v1176_v13 = vadd.f32 -1.0, %v1443_v7  ;;  %vm688_vm7 = vcmp.gt.f32.partialorder %v2130_v1, 0.0  ;;  %v1311_v17 = vpop.f32.mrf.mxu0 }
 0x10b   :  { %v782_v16 = vmul.f32 1.442695, %v2260_v45  ;;  %v1447_v42 = vpop.eup %1446  ;;  %1039 = vst.msk [vmem:[%s2560_s3 + $0x170] sm:$0xff] %vm992_vm2, %v974_v12  ;;  %v945_v26 = vsel %vm689_vm5, %v2121_v63, %v1144_v10  ;;  %v1143_v24 = vadd.f32 -1.0, %v1445_v8  ;;  %1462 = vpow2.f32 %v840_v38  ;;  %v643_v56 = vpop.f32.mrf.mxu1 }
 0x10c   :  { %v846_v28 = vmul.f32 1.442695, %v2271_v37  ;;  %1010 = vst.msk [vmem:[%s2560_s3 + $0x88] sm:$0xff] %vm992_vm2, %v945_v26  ;;  %v977_v43 = vsel %vm721_vm6, %v2125_v20, %v1176_v13  ;;  %vm720_vm8 = vcmp.gt.f32.partialorder %v2140_v23, 0.0  ;;  %v1175_v25 = vadd.f32 -1.0, %v1447_v42 }
 0x10d   :  { %1464 = vpow2.f32 %v782_v16  ;;  %v1449_v63 = vpop.eup %1448  ;;  %1042 = vst.msk [vmem:[%s2560_s3 + $0x188] sm:$0xff] %vm992_vm2, %v977_v43  ;;  %v944_v14 = vsel %vm688_vm7, %v2130_v1, %v1143_v24  ;;  %v780_v33 = vmul.f32 1.442695, %v2276_v11  ;;  %v2309_v20 = vadd.f32 %v1798_v5, %v2198_v39  ;;  %v483_v39 = vpop.f32.mrf.mxu0 }
 0x10e   :  { %1466 = vpow2.f32 %v846_v28  ;;  %v1451_v27 = vpop.eup %1450  ;;  %1009 = vst.msk [vmem:[%s2560_s3 + $0x80] sm:$0xff] %vm992_vm2, %v944_v14  ;;  %v976_v34 = vsel %vm720_vm8, %v2140_v23, %v1175_v25  ;;  %v1146_v35 = vadd.f32 -1.0, %v1449_v63  ;;  %v2318_v15 = vadd.f32 %v2229_v50, %v1798_v5  ;;  %v1362_v30 = vpop.f32.mrf.mxu1 }
 0x10f   :  { %v2321_v1 = vadd.f32 %v1356_v59, %v1798_v5  ;;  %v1453_v36 = vpop.eup %1452  ;;  %1041 = vst.msk [vmem:[%s2560_s3 + $0x180] sm:$0xff] %vm992_vm2, %v976_v34  ;;  %vm691_vm9 = vcmp.gt.f32.partialorder %v2165_v9, 0.0  ;;  %v1178_v52 = vadd.f32 -1.0, %v1451_v27  ;;  %1468 = vpow2.f32 %v780_v33  ;;  %v1314_v58 = vpop.f32.mrf.mxu0 }
 0x110   :  { %v844_v23 = vmul.f32 1.442695, %v2309_v20  ;;  %v947_v41 = vsel %vm691_vm9, %v2165_v9, %v1146_v35  ;;  %vm723_vm10 = vcmp.gt.f32.partialorder %v2169_v55, 0.0  ;;  %v1145_v46 = vadd.f32 -1.0, %v1453_v36  ;;  %v653_v8 = vpop.f32.mrf.mxu1 }
 0x111   :  { %v786_v47 = vmul.f32 1.442695, %v2318_v15  ;;  %1012 = vst.msk [vmem:[%s2560_s3 + $0x98] sm:$0xff] %vm992_vm2, %v947_v41  ;;  %v979_v53 = vsel %vm723_vm10, %v2169_v55, %v1178_v52  ;;  %vm690_vm11 = vcmp.gt.f32.partialorder %v2178_v32, 0.0  ;;  %v850_v19 = vmul.f32 1.442695, %v2321_v1  ;;  %v493_v7 = vpop.f32.mrf.mxu0 }
 0x112   :  { %1470 = vpow2.f32 %v844_v23  ;;  %v1455_v49 = vpop.eup %1454  ;;  %1044 = vst.msk [vmem:[%s2560_s3 + $0x198] sm:$0xff] %vm992_vm2, %v979_v53  ;;  %v946_v9 = vsel %vm690_vm11, %v2178_v32, %v1145_v46  ;;  %v2346_v50 = vadd.f32 %v1798_v5, %v2262_v61  ;;  %v2349_v55 = vadd.f32 %v1798_v5, %v633_v4 }
 0x113   :  { %1472 = vpow2.f32 %v786_v47  ;;  %v1457_v22 = vpop.eup %1456  ;;  %1011 = vst.msk [vmem:[%s2560_s3 + $0x90] sm:$0xff] %vm992_vm2, %v946_v9  ;;  %v1177_v51 = vadd.f32 -1.0, %v1455_v49  ;;  %v2356_v57 = vadd.f32 %v1311_v17, %v1798_v5  ;;  %v2359_v32 = vadd.f32 %v1359_v29, %v1798_v5  ;;  %v1317_v25 = vpop.f32.mrf.mxu0 }
 0x114   :  { %1474 = vpow2.f32 %v850_v19  ;;  %v1459_v59 = vpop.eup %1458  ;;  %vm722_vm12 = vcmp.gt.f32.partialorder %v2206_v44, 0.0  ;;  %vm693_vm13 = vcmp.gt.f32.partialorder %v2210_v21, 0.0  ;;  %v1148_v60 = vadd.f32 -1.0, %v1457_v22 }
 0x115   :  { %v784_v62 = vmul.f32 1.442695, %v2346_v50  ;;  %v1461_v40 = vpop.eup %1460  ;;  %v978_v0 = vsel %vm722_vm12, %v2206_v44, %v1177_v51  ;;  %vm725_vm14 = vcmp.gt.f32.partialorder %v2214_v18, 0.0  ;;  %v1180_v2 = vadd.f32 -1.0, %v1459_v59  ;;  %v503_v53 = vpop.f32.mrf.mxu0 }
 0x116   :  { %v848_v54 = vmul.f32 1.442695, %v2349_v55  ;;  %1043 = vst.msk [vmem:[%s2560_s3 + $0x190] sm:$0xff] %vm992_vm2, %v978_v0  ;;  %v949_v61 = vsel %vm693_vm13, %v2210_v21, %v1148_v60  ;;  %v1147_v31 = vadd.f32 -1.0, %v1461_v40  ;;  %v790_v6 = vmul.f32 1.442695, %v2356_v57 }
 0x117   :  { %1476 = vpow2.f32 %v784_v62  ;;  %1014 = vst.msk [vmem:[%s2560_s3 + $0xa8] sm:$0xff] %vm992_vm2, %v949_v61  ;;  %v981_v44 = vsel %vm725_vm14, %v2214_v18, %v1180_v2  ;;  %vm692_vm15 = vcmp.gt.f32.partialorder %v2220_v48, 0.0  ;;  %v854_v4 = vmul.f32 1.442695, %v2359_v32 }
 0x118   :  { %1478 = vpow2.f32 %v848_v54  ;;  %v1463_v10 = vpop.eup %1462  ;;  %1046 = vst.msk [vmem:[%s2560_s3 + $0x1a8] sm:$0xff] %vm992_vm2, %v981_v44  ;;  %v948_v21 = vsel %vm692_vm15, %v2220_v48, %v1147_v31  ;;  %v2386_v38 = vadd.f32 %v1798_v5, %v483_v39  ;;  %v2389_v18 = vadd.f32 %v1798_v5, %v643_v56 }
 0x119   :  { %1480 = vpow2.f32 %v790_v6  ;;  %1013 = vst.msk [vmem:[%s2560_s3 + $0xa0] sm:$0xff] %vm992_vm2, %v948_v21  ;;  %v1179_v13 = vadd.f32 -1.0, %v1463_v10  ;;  %v2396_v16 = vadd.f32 %v1314_v58, %v1798_v5  ;;  %v2399_v48 = vadd.f32 %v1362_v30, %v1798_v5 }
 0x11a   :  { %v1465_v12 = vpop.eup %1464  ;;  %1482 = vpow2.f32 %v854_v4  ;;  %vm724_vm0 = vcmp.gt.f32.partialorder %v2256_v3, 0.0  ;;  %vm695_vm1 = vcmp.gt.f32.partialorder %v2260_v45, 0.0  ;;  %v788_v24 = vmul.f32 1.442695, %v2386_v38 }
 0x11b   :  { %v1467_v42 = vpop.eup %1466  ;;  %v1150_v26 = vadd.f32 -1.0, %v1465_v12  ;;  %v980_v28 = vsel %vm724_vm0, %v2256_v3, %v1179_v13  ;;  %vm727_vm3 = vcmp.gt.f32.partialorder %v2271_v37, 0.0  ;;  %v852_v43 = vmul.f32 1.442695, %v2389_v18  ;;  %v1365_v3 = vpop.f32.mrf.mxu1 }
 0x11c   :  { %v1182_v17 = vadd.f32 -1.0, %v1467_v42  ;;  %v1469_v29 = vpop.eup %1468  ;;  %1045 = vst.msk [vmem:[%s2560_s3 + $0x1a0] sm:$0xff] %vm992_vm2, %v980_v28  ;;  %vm694_vm4 = vcmp.gt.f32.partialorder %v2276_v11, 0.0  ;;  %1484 = vpow2.f32 %v788_v24  ;;  %v794_v14 = vmul.f32 1.442695, %v2396_v16 }
 0x11d   :  { %v951_v63 = vsel %vm695_vm1, %v2260_v45, %v1150_v26  ;;  %v1149_v27 = vadd.f32 -1.0, %v1469_v29  ;;  %1486 = vpow2.f32 %v852_v43  ;;  %v858_v34 = vmul.f32 1.442695, %v2399_v48  ;;  %v663_v9 = vpop.f32.mrf.mxu1 }
 0x11e   :  { %1016 = vst.msk [vmem:[%s2560_s3 + $0xb8] sm:$0xff] %vm992_vm2, %v951_v63  ;;  %v983_v33 = vsel %vm727_vm3, %v2271_v37, %v1182_v17  ;;  %1488 = vpow2.f32 %v794_v14  ;;  %v2425_v45 = vadd.f32 %v1798_v5, %v493_v7  ;;  %v2428_v36 = vadd.f32 %v1798_v5, %v653_v8 }
 0x11f   :  { %v1471_v35 = vpop.eup %1470  ;;  %1048 = vst.msk [vmem:[%s2560_s3 + $0x1b8] sm:$0xff] %vm992_vm2, %v983_v33  ;;  %v2431_v52 = vadd.f32 %v1317_v25, %v1798_v5  ;;  %v950_v23 = vsel %vm694_vm4, %v2276_v11, %v1149_v27  ;;  %1490 = vpow2.f32 %v858_v34  ;;  %v2437_v41 = vadd.f32 %v1365_v3, %v1798_v5 }
 0x120   :  { %v1473_v37 = vpop.eup %1472  ;;  %v1181_v39 = vadd.f32 -1.0, %v1471_v35  ;;  %1015 = vst.msk [vmem:[%s2560_s3 + $0xb0] sm:$0xff] %vm992_vm2, %v950_v23  ;;  %vm726_vm5 = vcmp.gt.f32.partialorder %v2309_v20, 0.0  ;;  %v792_v56 = vmul.f32 1.442695, %v2425_v45  ;;  %vm697_vm6 = vcmp.gt.f32.partialorder %v2318_v15, 0.0 }
 0x121   :  { %v1475_v46 = vpop.eup %1474  ;;  %v1152_v47 = vadd.f32 -1.0, %v1473_v37  ;;  %v856_v49 = vmul.f32 1.442695, %v2428_v36  ;;  %vm729_vm7 = vcmp.gt.f32.partialorder %v2321_v1, 0.0  ;;  %v798_v51 = vmul.f32 1.442695, %v2431_v52 }
 0x122   :  { %v982_v19 = vsel %vm726_vm5, %v2309_v20, %v1181_v39  ;;  %v1184_v11 = vadd.f32 -1.0, %v1475_v46  ;;  %1492 = vpow2.f32 %v792_v56  ;;  %v862_v59 = vmul.f32 1.442695, %v2437_v41 }
 0x123   :  { %1047 = vst.msk [vmem:[%s2560_s3 + $0x1b0] sm:$0xff] %vm992_vm2, %v982_v19  ;;  %v953_v22 = vsel %vm697_vm6, %v2318_v15, %v1152_v47  ;;  %1494 = vpow2.f32 %v856_v49  ;;  %v2462_v60 = vadd.f32 %v1798_v5, %v503_v53  ;;  %v2469_v30 = vadd.f32 %v1798_v5, %v663_v9 }
 0x124   :  { %v1477_v58 = vpop.eup %1476  ;;  %1018 = vst.msk [vmem:[%s2560_s3 + $0xc8] sm:$0xff] %vm992_vm2, %v953_v22  ;;  %v985_v20 = vsel %vm729_vm7, %v2321_v1, %v1184_v11  ;;  %1496 = vpow2.f32 %v798_v51  ;;  %vm696_vm8 = vcmp.gt.f32.partialorder %v2346_v50, 0.0  ;;  %vm728_vm9 = vcmp.gt.f32.partialorder %v2349_v55, 0.0 }
 0x125   :  { %v1479_v15 = vpop.eup %1478  ;;  %1050 = vst.msk [vmem:[%s2560_s3 + $0x1c8] sm:$0xff] %vm992_vm2, %v985_v20  ;;  %v1151_v62 = vadd.f32 -1.0, %v1477_v58  ;;  %1498 = vpow2.f32 %v862_v59  ;;  %v796_v0 = vmul.f32 1.442695, %v2462_v60  ;;  %v860_v31 = vmul.f32 1.442695, %v2469_v30 }
 0x126   :  { %v1481_v40 = vpop.eup %1480  ;;  %v1183_v1 = vadd.f32 -1.0, %v1479_v15  ;;  %vm699_vm10 = vcmp.gt.f32.partialorder %v2356_v57, 0.0  ;;  %vm731_vm11 = vcmp.gt.f32.partialorder %v2359_v32, 0.0  ;;  %vm698_vm12 = vcmp.gt.f32.partialorder %v2386_v38, 0.0 }
 0x127   :  { %v1483_v2 = vpop.eup %1482  ;;  %v952_v54 = vsel %vm696_vm8, %v2346_v50, %v1151_v62  ;;  %v1154_v61 = vadd.f32 -1.0, %v1481_v40  ;;  %1500 = vpow2.f32 %v796_v0  ;;  %vm730_vm13 = vcmp.gt.f32.partialorder %v2389_v18, 0.0 }
 0x128   :  { %1017 = vst.msk [vmem:[%s2560_s3 + $0xc0] sm:$0xff] %vm992_vm2, %v952_v54  ;;  %v984_v5 = vsel %vm728_vm9, %v2349_v55, %v1183_v1  ;;  %v1186_v6 = vadd.f32 -1.0, %v1483_v2  ;;  %1502 = vpow2.f32 %v860_v31  ;;  %vm701_vm14 = vcmp.gt.f32.partialorder %v2396_v16, 0.0 }
 0x129   :  { %1049 = vst.msk [vmem:[%s2560_s3 + $0x1c0] sm:$0xff] %vm992_vm2, %v984_v5  ;;  %v955_v50 = vsel %vm699_vm10, %v2356_v57, %v1154_v61  ;;  %v1485_v44 = vpop.eup %1484  ;;  %vm733_vm15 = vcmp.gt.f32.partialorder %v2399_v48, 0.0  ;;  %vm700_vm0 = vcmp.gt.f32.partialorder %v2425_v45, 0.0  ;;  %vm732_vm1 = vcmp.gt.f32.partialorder %v2428_v36, 0.0 }
 0x12a   :  { %1020 = vst.msk [vmem:[%s2560_s3 + $0xd8] sm:$0xff] %vm992_vm2, %v955_v50  ;;  %v987_v55 = vsel %vm731_vm11, %v2359_v32, %v1186_v6  ;;  %v1487_v4 = vpop.eup %1486  ;;  %v1153_v7 = vadd.f32 -1.0, %v1485_v44  ;;  %vm703_vm3 = vcmp.gt.f32.partialorder %v2431_v52, 0.0  ;;  %vm735_vm4 = vcmp.gt.f32.partialorder %v2437_v41, 0.0 }
 0x12b   :  { %1052 = vst.msk [vmem:[%s2560_s3 + $0x1d8] sm:$0xff] %vm992_vm2, %v987_v55  ;;  %v1489_v10 = vpop.eup %1488  ;;  %v1185_v57 = vadd.f32 -1.0, %v1487_v4  ;;  %vm702_vm5 = vcmp.gt.f32.partialorder %v2462_v60, 0.0  ;;  %vm734_vm6 = vcmp.gt.f32.partialorder %v2469_v30, 0.0 }
 0x12c   :  { %v1491_v21 = vpop.eup %1490  ;;  %v954_v8 = vsel %vm698_vm12, %v2386_v38, %v1153_v7  ;;  %v1156_v12 = vadd.f32 -1.0, %v1489_v10 }
 0x12d   :  { %1019 = vst.msk [vmem:[%s2560_s3 + $0xd0] sm:$0xff] %vm992_vm2, %v954_v8  ;;  %v986_v32 = vsel %vm730_vm13, %v2389_v18, %v1185_v57  ;;  %v1188_v13 = vadd.f32 -1.0, %v1491_v21 }
 0x12e   :  { %1051 = vst.msk [vmem:[%s2560_s3 + $0x1d0] sm:$0xff] %vm992_vm2, %v986_v32  ;;  %v957_v38 = vsel %vm701_vm14, %v2396_v16, %v1156_v12 }
 0x12f   :  { %v1493_v42 = vpop.eup %1492  ;;  %1022 = vst.msk [vmem:[%s2560_s3 + $0xe8] sm:$0xff] %vm992_vm2, %v957_v38  ;;  %v989_v18 = vsel %vm733_vm15, %v2399_v48, %v1188_v13 }
 0x130   :  { %v1495_v26 = vpop.eup %1494  ;;  %1054 = vst.msk [vmem:[%s2560_s3 + $0x1e8] sm:$0xff] %vm992_vm2, %v989_v18  ;;  %v1155_v24 = vadd.f32 -1.0, %v1493_v42 }
 0x131   :  { %v1497_v28 = vpop.eup %1496  ;;  %v1187_v16 = vadd.f32 -1.0, %v1495_v26 }
 0x132   :  { %v1499_v17 = vpop.eup %1498  ;;  %v956_v43 = vsel %vm700_vm0, %v2425_v45, %v1155_v24  ;;  %v1158_v25 = vadd.f32 -1.0, %v1497_v28 }
 0x133   :  { %1021 = vst.msk [vmem:[%s2560_s3 + $0xe0] sm:$0xff] %vm992_vm2, %v956_v43  ;;  %v988_v48 = vsel %vm732_vm1, %v2428_v36, %v1187_v16  ;;  %v1190_v29 = vadd.f32 -1.0, %v1499_v17 }
 0x134   :  { %v1501_v63 = vpop.eup %1500  ;;  %1053 = vst.msk [vmem:[%s2560_s3 + $0x1e0] sm:$0xff] %vm992_vm2, %v988_v48  ;;  %v959_v14 = vsel %vm703_vm3, %v2431_v52, %v1158_v25 }
 0x135   :  { %v1503_v3 = vpop.eup %1502  ;;  %1024 = vst.msk [vmem:[%s2560_s3 + $0xf8] sm:$0xff] %vm992_vm2, %v959_v14  ;;  %v991_v33 = vsel %vm735_vm4, %v2437_v41, %v1190_v29  ;;  %v1157_v27 = vadd.f32 -1.0, %v1501_v63 }
 0x136   :  { %1056 = vst.msk [vmem:[%s2560_s3 + $0x1f8] sm:$0xff] %vm992_vm2, %v991_v33  ;;  %v1189_v34 = vadd.f32 -1.0, %v1503_v3 }
 0x137   :  { %v958_v35 = vsel %vm702_vm5, %v2462_v60, %v1157_v27 }
 0x138   :  { %1023 = vst.msk [vmem:[%s2560_s3 + $0xf0] sm:$0xff] %vm992_vm2, %v958_v35  ;;  %v990_v45 = vsel %vm734_vm6, %v2469_v30, %v1189_v34 }
 0x139   :  { %1055 = vst.msk [vmem:[%s2560_s3 + $0x1f0] sm:$0xff] %vm992_vm2, %v990_v45 }

</bundles_post_ra>
